<compile_context>
chip_gen: v5e
topology: v5e:2x2
jax: 0.10.0
libtpu: 0.0.40
codegen_flags: <defaults>
</compile_context>

<pallas_src>
import functools

import jax
import jax.numpy as jnp
from jax.experimental import pallas as pl
from jax.experimental.pallas import tpu as pltpu

F_IN = 52   # input features
HID = 64    # hidden width
OUT = 2     # output classes


def mlp_kernel(x_ref, w1_ref, b1_ref, w2_ref, b2_ref,
               w3_ref, b3_ref, w4_ref, b4_ref, o_ref):
    # fc1 + relu: cast x to bf16 at the MXU boundary, accumulate in f32.
    x = x_ref[...].astype(jnp.bfloat16)
    h = jnp.dot(x, w1_ref[...], preferred_element_type=jnp.float32)
    h = jnp.maximum(h + b1_ref[...], 0.0)
    # fc2 + relu
    h = jnp.dot(h.astype(jnp.bfloat16), w2_ref[...],
                preferred_element_type=jnp.float32)
    h = jnp.maximum(h + b2_ref[...], 0.0)
    # fc3 + relu
    h = jnp.dot(h.astype(jnp.bfloat16), w3_ref[...],
                preferred_element_type=jnp.float32)
    h = jnp.maximum(h + b3_ref[...], 0.0)
    # fc4 (real 2 output columns only)
    logits = jnp.dot(h.astype(jnp.bfloat16), w4_ref[...],
                     preferred_element_type=jnp.float32)
    logits = logits + b4_ref[...]
    # 2-class softmax on the real columns (exact normalization; cost is tiny).
    m = jnp.max(logits, axis=1, keepdims=True)
    e = jnp.exp(logits - m)
    o_ref[...] = (e / jnp.sum(e, axis=1, keepdims=True)).astype(o_ref.dtype)


def prepare_params(params):
    """One-time prep: bf16 weights for the MXU, f32 row-vector biases."""
    out = []
    for w, b in params:
        out.append((jnp.asarray(w).astype(jnp.bfloat16),
                    jnp.asarray(b, jnp.float32).reshape(1, -1)))
    return tuple(out)


@functools.partial(jax.jit, static_argnames=("tile_n",))
def net_forward(x, prepared, tile_n=2048):
    """x: (N, 52) float array. prepared: output of prepare_params."""
    (w1, b1), (w2, b2), (w3, b3), (w4, b4) = prepared
    N = x.shape[0]

    # Batch tile: multiple of 8, big enough to amortize per-step overhead;
    # VMEM footprint (~2 MiB/buffer at 2048 rows) fits all chips incl. v7x.
    tile_n = int(min(tile_n, pl.cdiv(N, 8) * 8))
    grid = (pl.cdiv(N, tile_n),)

    # Weights/biases stay resident: constant block index -> no re-DMA per step.
    const = lambda a: pl.BlockSpec(a.shape, lambda i: (0,) * a.ndim)

    x_bytes = jnp.dtype(x.dtype).itemsize
    flops = 2 * N * (F_IN * HID + 2 * HID * HID + HID * OUT)
    transcendentals = N * OUT
    bytes_accessed = (N * F_IN * x_bytes                       # x read
                      + N * OUT * 4                            # probs write
                      + (F_IN * HID + 2 * HID * HID + HID * OUT) * 2   # weights
                      + (3 * HID + OUT) * 4)                   # biases

    return pl.pallas_call(
        mlp_kernel,
        out_shape=jax.ShapeDtypeStruct((N, OUT), jnp.float32),
        grid=grid,
        in_specs=[
            pl.BlockSpec((tile_n, F_IN), lambda i: (i, 0)),    # x tile
            const(w1), const(b1),
            const(w2), const(b2),
            const(w3), const(b3),
            const(w4), const(b4),
        ],
        out_specs=pl.BlockSpec((tile_n, OUT), lambda i: (i, 0)),
        compiler_params=pltpu.CompilerParams(
            dimension_semantics=("parallel",)),                # megacore split
        cost_estimate=pl.CostEstimate(
            flops=flops,
            transcendentals=transcendentals,
            bytes_accessed=bytes_accessed),
    )(x, w1, b1, w2, b2, w3, b3, w4, b4)


def init_params(key):
    # Deterministic init mimicking nn.Linear defaults (uniform +- 1/sqrt(fan_in)).
    dims = [(F_IN, HID), (HID, HID), (HID, HID), (HID, OUT)]
    params = []
    for fan_in, fan_out in dims:
        key, kw, kb = jax.random.split(key, 3)
        bound = 1.0 / jnp.sqrt(fan_in)
        # stored as (in, out) = transpose of PyTorch's (out, in)
        w = jax.random.uniform(kw, (fan_in, fan_out), jnp.float32, -bound, bound)
        b = jax.random.uniform(kb, (1, fan_out), jnp.float32, -bound, bound)
        params.append((w, b))
    return params


def ref_forward(x, params):
    (w1, b1), (w2, b2), (w3, b3), (w4, b4) = params
    h = jax.nn.relu(x @ w1 + b1)
    h = jax.nn.relu(h @ w2 + b2)
    h = jax.nn.relu(h @ w3 + b3)
    return jax.nn.softmax(h @ w4 + b4, axis=1)


if __name__ == "__main__":
    key = jax.random.PRNGKey(0)
    key, kx = jax.random.split(key)

    batch = 8
    x = jax.random.normal(kx, (batch, F_IN), dtype=jnp.float32)
    params = init_params(key)
    prepared = prepare_params(params)

    out = net_forward(x, prepared)
    out = jax.block_until_ready(out)

    # sanity: shape, rows sum to 1, and close to the f32 pure-JAX reference
    assert out.shape == (batch, OUT)
    assert jnp.allclose(jnp.sum(out, axis=1), 1.0, atol=1e-3)
    ref = ref_forward(x, params)
    assert jnp.allclose(out, ref, atol=5e-2), float(jnp.max(jnp.abs(out - ref)))

    print("KERNEL_OK")
</pallas_src>

<mosaic_0001>
module attributes {stable_mosaic.version = 11 : i64} {
  func.func @mlp_kernel(%arg0: i32, %arg1: memref<8x52xf32, #tpu.memory_space<vmem>>, %arg2: memref<52x64xbf16, #tpu.memory_space<vmem>>, %arg3: memref<1x64xf32, #tpu.memory_space<vmem>>, %arg4: memref<64x64xbf16, #tpu.memory_space<vmem>>, %arg5: memref<1x64xf32, #tpu.memory_space<vmem>>, %arg6: memref<64x64xbf16, #tpu.memory_space<vmem>>, %arg7: memref<1x64xf32, #tpu.memory_space<vmem>>, %arg8: memref<64x2xbf16, #tpu.memory_space<vmem>>, %arg9: memref<1x2xf32, #tpu.memory_space<vmem>>, %arg10: memref<8x2xf32, #tpu.memory_space<vmem>>) attributes {dimension_semantics = [#tpu.dimension_semantics<parallel>], iteration_bounds = array<i64: 1>, scalar_prefetch = 0 : i64, scratch_operands = 0 : i64, tpu.core_type = #tpu.core_type<tc>, window_params = [{transform_indices = @transform_0, window_bounds = array<i64: 8, 52>}, {pipeline_mode = #tpu.pipeline_mode<synchronous>, transform_indices = @transform_1, window_bounds = array<i64: 52, 64>}, {pipeline_mode = #tpu.pipeline_mode<synchronous>, transform_indices = @transform_2, window_bounds = array<i64: 1, 64>}, {pipeline_mode = #tpu.pipeline_mode<synchronous>, transform_indices = @transform_3, window_bounds = array<i64: 64, 64>}, {pipeline_mode = #tpu.pipeline_mode<synchronous>, transform_indices = @transform_4, window_bounds = array<i64: 1, 64>}, {pipeline_mode = #tpu.pipeline_mode<synchronous>, transform_indices = @transform_5, window_bounds = array<i64: 64, 64>}, {pipeline_mode = #tpu.pipeline_mode<synchronous>, transform_indices = @transform_6, window_bounds = array<i64: 1, 64>}, {pipeline_mode = #tpu.pipeline_mode<synchronous>, transform_indices = @transform_7, window_bounds = array<i64: 64, 2>}, {pipeline_mode = #tpu.pipeline_mode<synchronous>, transform_indices = @transform_8, window_bounds = array<i64: 1, 2>}, {transform_indices = @transform_9, window_bounds = array<i64: 8, 2>}]} {
    %c0 = arith.constant 0 : index
    %c0_0 = arith.constant 0 : index
    %0 = vector.load %arg1[%c0, %c0_0] : memref<8x52xf32, #tpu.memory_space<vmem>>, vector<8x52xf32>
    %1 = arith.truncf %0 : vector<8x52xf32> to vector<8x52xbf16>
    %c0_1 = arith.constant 0 : index
    %c0_2 = arith.constant 0 : index
    %2 = vector.load %arg2[%c0_1, %c0_2] : memref<52x64xbf16, #tpu.memory_space<vmem>>, vector<52x64xbf16>
    %cst = arith.constant dense<0.000000e+00> : vector<8x64xf32>
    %3 = tpu.matmul %1, %2, %cst {dimension_numbers = #tpu.dot_dimension_numbers<[1], [0], [0], [1], [0, 0, 1, 1], [], []>} : vector<8x52xbf16>, vector<52x64xbf16>, vector<8x64xf32> -> vector<8x64xf32>
    %c0_3 = arith.constant 0 : index
    %c0_4 = arith.constant 0 : index
    %4 = vector.load %arg3[%c0_3, %c0_4] : memref<1x64xf32, #tpu.memory_space<vmem>>, vector<1x64xf32>
    %5 = vector.broadcast %4 : vector<1x64xf32> to vector<8x64xf32>
    %6 = arith.addf %3, %5 : vector<8x64xf32>
    %cst_5 = arith.constant 0.000000e+00 : f32
    %7 = vector.broadcast %cst_5 : f32 to vector<8x64xf32>
    %8 = arith.maximumf %6, %7 : vector<8x64xf32>
    %9 = arith.truncf %8 : vector<8x64xf32> to vector<8x64xbf16>
    %c0_6 = arith.constant 0 : index
    %c0_7 = arith.constant 0 : index
    %10 = vector.load %arg4[%c0_6, %c0_7] : memref<64x64xbf16, #tpu.memory_space<vmem>>, vector<64x64xbf16>
    %cst_8 = arith.constant dense<0.000000e+00> : vector<8x64xf32>
    %11 = tpu.matmul %9, %10, %cst_8 {dimension_numbers = #tpu.dot_dimension_numbers<[1], [0], [0], [1], [0, 0, 1, 1], [], []>} : vector<8x64xbf16>, vector<64x64xbf16>, vector<8x64xf32> -> vector<8x64xf32>
    %c0_9 = arith.constant 0 : index
    %c0_10 = arith.constant 0 : index
    %12 = vector.load %arg5[%c0_9, %c0_10] : memref<1x64xf32, #tpu.memory_space<vmem>>, vector<1x64xf32>
    %13 = vector.broadcast %12 : vector<1x64xf32> to vector<8x64xf32>
    %14 = arith.addf %11, %13 : vector<8x64xf32>
    %cst_11 = arith.constant 0.000000e+00 : f32
    %15 = vector.broadcast %cst_11 : f32 to vector<8x64xf32>
    %16 = arith.maximumf %14, %15 : vector<8x64xf32>
    %17 = arith.truncf %16 : vector<8x64xf32> to vector<8x64xbf16>
    %c0_12 = arith.constant 0 : index
    %c0_13 = arith.constant 0 : index
    %18 = vector.load %arg6[%c0_12, %c0_13] : memref<64x64xbf16, #tpu.memory_space<vmem>>, vector<64x64xbf16>
    %cst_14 = arith.constant dense<0.000000e+00> : vector<8x64xf32>
    %19 = tpu.matmul %17, %18, %cst_14 {dimension_numbers = #tpu.dot_dimension_numbers<[1], [0], [0], [1], [0, 0, 1, 1], [], []>} : vector<8x64xbf16>, vector<64x64xbf16>, vector<8x64xf32> -> vector<8x64xf32>
    %c0_15 = arith.constant 0 : index
    %c0_16 = arith.constant 0 : index
    %20 = vector.load %arg7[%c0_15, %c0_16] : memref<1x64xf32, #tpu.memory_space<vmem>>, vector<1x64xf32>
    %21 = vector.broadcast %20 : vector<1x64xf32> to vector<8x64xf32>
    %22 = arith.addf %19, %21 : vector<8x64xf32>
    %cst_17 = arith.constant 0.000000e+00 : f32
    %23 = vector.broadcast %cst_17 : f32 to vector<8x64xf32>
    %24 = arith.maximumf %22, %23 : vector<8x64xf32>
    %25 = arith.truncf %24 : vector<8x64xf32> to vector<8x64xbf16>
    %c0_18 = arith.constant 0 : index
    %c0_19 = arith.constant 0 : index
    %26 = vector.load %arg8[%c0_18, %c0_19] : memref<64x2xbf16, #tpu.memory_space<vmem>>, vector<64x2xbf16>
    %cst_20 = arith.constant dense<0.000000e+00> : vector<8x2xf32>
    %27 = tpu.matmul %25, %26, %cst_20 {dimension_numbers = #tpu.dot_dimension_numbers<[1], [0], [0], [1], [0, 0, 1, 1], [], []>} : vector<8x64xbf16>, vector<64x2xbf16>, vector<8x2xf32> -> vector<8x2xf32>
    %c0_21 = arith.constant 0 : index
    %c0_22 = arith.constant 0 : index
    %28 = vector.load %arg9[%c0_21, %c0_22] : memref<1x2xf32, #tpu.memory_space<vmem>>, vector<1x2xf32>
    %29 = vector.broadcast %28 : vector<1x2xf32> to vector<8x2xf32>
    %30 = arith.addf %27, %29 : vector<8x2xf32>
    %cst_23 = arith.constant dense<0xFF800000> : vector<8xf32>
    %31 = vector.multi_reduction <maximumf>, %30, %cst_23 [1] : vector<8x2xf32> to vector<8xf32>
    %32 = vector.shape_cast %31 : vector<8xf32> to vector<8x1xf32>
    %33 = vector.broadcast %32 : vector<8x1xf32> to vector<8x2xf32>
    %34 = arith.subf %30, %33 : vector<8x2xf32>
    %35 = math.exp %34 : vector<8x2xf32>
    %cst_24 = arith.constant dense<0.000000e+00> : vector<8xf32>
    %36 = vector.multi_reduction <add>, %35, %cst_24 [1] : vector<8x2xf32> to vector<8xf32>
    %37 = vector.shape_cast %36 : vector<8xf32> to vector<8x1xf32>
    %38 = vector.broadcast %37 : vector<8x1xf32> to vector<8x2xf32>
    %39 = arith.divf %35, %38 : vector<8x2xf32>
    %c0_25 = arith.constant 0 : index
    %c0_26 = arith.constant 0 : index
    %40 = vector.load %arg10[%c0_25, %c0_26] : memref<8x2xf32, #tpu.memory_space<vmem>>, vector<8x2xf32>
    tpu.vector_store %arg10[%c0_25, %c0_26], %39 {strides = array<i32>} : memref<8x2xf32, #tpu.memory_space<vmem>>, vector<8x2xf32>,
    return
  }
  func.func @transform_0(%arg0: i32) -> (i32, i32) {
    %c0_i32 = arith.constant 0 : i32
    %c0_i32_0 = arith.constant 0 : i32
    return %arg0, %c0_i32 : i32, i32
  }
  func.func @transform_1(%arg0: i32) -> (i32, i32) {
    %c0_i32 = arith.constant 0 : i32
    %c0_i32_0 = arith.constant 0 : i32
    %c0_i32_1 = arith.constant 0 : i32
    return %c0_i32, %c0_i32_0 : i32, i32
  }
  func.func @transform_2(%arg0: i32) -> (i32, i32) {
    %c0_i32 = arith.constant 0 : i32
    %c0_i32_0 = arith.constant 0 : i32
    %c0_i32_1 = arith.constant 0 : i32
    return %c0_i32, %c0_i32_0 : i32, i32
  }
  func.func @transform_3(%arg0: i32) -> (i32, i32) {
    %c0_i32 = arith.constant 0 : i32
    %c0_i32_0 = arith.constant 0 : i32
    %c0_i32_1 = arith.constant 0 : i32
    return %c0_i32, %c0_i32_0 : i32, i32
  }
  func.func @transform_4(%arg0: i32) -> (i32, i32) {
    %c0_i32 = arith.constant 0 : i32
    %c0_i32_0 = arith.constant 0 : i32
    %c0_i32_1 = arith.constant 0 : i32
    return %c0_i32, %c0_i32_0 : i32, i32
  }
  func.func @transform_5(%arg0: i32) -> (i32, i32) {
    %c0_i32 = arith.constant 0 : i32
    %c0_i32_0 = arith.constant 0 : i32
    %c0_i32_1 = arith.constant 0 : i32
    return %c0_i32, %c0_i32_0 : i32, i32
  }
  func.func @transform_6(%arg0: i32) -> (i32, i32) {
    %c0_i32 = arith.constant 0 : i32
    %c0_i32_0 = arith.constant 0 : i32
    %c0_i32_1 = arith.constant 0 : i32
    return %c0_i32, %c0_i32_0 : i32, i32
  }
  func.func @transform_7(%arg0: i32) -> (i32, i32) {
    %c0_i32 = arith.constant 0 : i32
    %c0_i32_0 = arith.constant 0 : i32
    %c0_i32_1 = arith.constant 0 : i32
    return %c0_i32, %c0_i32_0 : i32, i32
  }
  func.func @transform_8(%arg0: i32) -> (i32, i32) {
    %c0_i32 = arith.constant 0 : i32
    %c0_i32_0 = arith.constant 0 : i32
    %c0_i32_1 = arith.constant 0 : i32
    return %c0_i32, %c0_i32_0 : i32, i32
  }
  func.func @transform_9(%arg0: i32) -> (i32, i32) {
    %c0_i32 = arith.constant 0 : i32
    %c0_i32_0 = arith.constant 0 : i32
    return %arg0, %c0_i32 : i32, i32
  }
}

</mosaic_0001>

<bundles_post_ra>
// kernel: net_forward.1
= control target key start
LH: loop header
LB: loop body
LE: loop exit
PB: predicated region body
PF: predicated region fallthrough
CT: control target
= control target key end

     0   :  { %14 = vsyncpa [#allocation3], 0  ;;  %s605_s0 = inlined_call_operand.hbm [shape: f32[8,52], index: 0, kind: input, shape index: {}]   ;;  %s606_s1 = inlined_call_operand.hbm [shape: bf16[52,64], index: 1, kind: input, shape index: {}]   ;;  %s607_s2 = inlined_call_operand.vmem [shape: f32[1,64], index: 2, kind: input, shape index: {}]   ;;  %s608_s3 = inlined_call_operand.vmem [shape: bf16[64,64], index: 3, kind: input, shape index: {}]   ;;  %s609_s4 = inlined_call_operand.vmem [shape: f32[1,64], index: 4, kind: input, shape index: {}]   ;;  %s610_s5 = inlined_call_operand.hbm [shape: bf16[64,64], index: 5, kind: input, shape index: {}]   ;;  %s611_s6 = inlined_call_operand.vmem [shape: f32[1,64], index: 6, kind: input, shape index: {}]   ;;  %s612_s7 = inlined_call_operand.vmem [shape: bf16[64,2], index: 7, kind: input, shape index: {}]   ;;  %s613_s8 = inlined_call_operand.vmem [shape: f32[1,2], index: 8, kind: input, shape index: {}]   ;;  %s614_s9 = inlined_call_operand.vmem [shape: f32[8,2], index: 9, kind: output, shape index: {}]  }
   0x1   :  { %15 = vsyncpa [#allocation5], 0  ;;  %s31_s11 = sshll.u32 %s606_s1, 4  ;;  %s496_s12 = smov [#allocation4]   ;;  %s32_s11 = int_to_ptr.hbm [resolvable:$true] %s31_s11 }
   0x2   :  { %s33_s13 = sshll.u32 %s496_s12, 4  ;;  %s21_s16 = sshll.u32 %s605_s0, 4  ;;  %s34_s13 = int_to_ptr.vmem [resolvable:$true] %s33_s13  ;;  %s22_s16 = int_to_ptr.hbm [resolvable:$true] %s21_s16 }
   0x3   :  { %s497_s17 = smov 64   ;;  %s498_s18 = smov 4  }
   0x4   :  { %39 = dma.hbm_to_vmem [thread:$0]  %s32_s11, 448, %s34_s13, [#allocation5], %s497_s17, %s497_s17, %s498_s18  }
   0x5   :  { %s499_s19 = smov [#allocation2]   ;;  %s50_s23 = sshll.u32 %s610_s5, 4  ;;  %s51_s23 = int_to_ptr.hbm [resolvable:$true] %s50_s23 }
   0x6   :  { %s23_s20 = sshll.u32 %s499_s19, 4  ;;  %s500_s1 = smov [#allocation6]   ;;  %s24_s20 = int_to_ptr.vmem [resolvable:$true] %s23_s20 }
   0x7   :  { %26 = dma.hbm_to_vmem [thread:$0]  %s22_s16, 128, %s24_s20, [#allocation3]  }
   0x8   :  { %s52_s24 = sshll.u32 %s500_s1, 4  ;;  %s53_s24 = int_to_ptr.vmem [resolvable:$true] %s52_s24 }
   0x9   :  { %58 = dma.hbm_to_vmem [thread:$0]  %s51_s23, 512, %s53_s24, [#allocation5], %s497_s17, %s497_s17, %s498_s18  }
   0xa   :  { %492 = dma.done.wait [#allocation3], 128  }
   0xb   :  { %493 = vsyncadd [#allocation3], 4294967168 }
   0xc   :  { %494 = dma.done.wait [#allocation5], 960  }
   0xd   :  { %495 = vsyncadd [#allocation5], 4294966336  ;;  %v86_v0 = vld [vmem:[#allocation4 + $0x18] sm:$0x3]  ;;  %v398_v2 = vld [vmem:[%s608_s3 + $0x18] sm:$0xff]  ;;  %vm116_vm0 = vcmask 1041408  }
   0xe   :  { %v104_v1 = vunpack.c.l.b16 %v86_v0  ;;  %v397_v3 = vld [vmem:[%s608_s3 + $0x10] sm:$0xff]  ;;  %179 = vmatpush.bf16.msra.mxu1 %v398_v2  ;;  %v394_v6 = vld [vmem:[#allocation4 + $0x10] sm:$0xff]  ;;  %v392_v8 = vld [vmem:[#allocation4] sm:$0xff]  ;;  %vm112_vm1 = vcmask 424960   ;;  %vm171_vm2 = vcmask 523264   ;;  %vm296_vm3 = vcmask 15360  }
   0xf   :  { %v393_v7 = vld [vmem:[#allocation4 + $0x8] sm:$0xff]  ;;  %v78_v9 = vld [vmem:[#allocation2] sm:$0xff]  ;;  %v396_v11 = vld [vmem:[%s608_s3 + $0x8] sm:$0xff] }
  0x10   :  { %v108_v4 = vpack.c.b16 %v104_v1, %v104_v1  ;;  %v79_v10 = vpack.c.bf16 %v78_v9, %v78_v9  ;;  %v395_v12 = vld [vmem:[%s608_s3] sm:$0xff]  ;;  %v401_v14 = vld [vmem:[#allocation6 + $0x10] sm:$0xff]  ;;  %v400_v21 = vld [vmem:[#allocation6 + $0x8] sm:$0xff] }
  0x11   :  { %v402_v13 = vld [vmem:[#allocation6 + $0x18] sm:$0xff]  ;;  %v399_v22 = vld [vmem:[#allocation6] sm:$0xff]  ;;  %v405_v24 = vld [vmem:[%s612_s7 + $0x10] sm:$0xff] }
  0x12   :  { %v118_v5 = vsel %vm116_vm0, %v108_v4, 0  ;;  %180 = vmatpush.bf16.msra.mxu1 %v397_v3  ;;  %233 = vmatpush.bf16.msra.mxu2 %v402_v13  ;;  %v412_v15 = vld [vmem:[%s607_s2] ss:$0 sm:$0xff]  ;;  %v406_v23 = vld [vmem:[%s612_s7 + $0x18] sm:$0xff]  ;;  %v404_v31 = vld [vmem:[%s612_s7 + $0x8] sm:$0xff] }
  0x13   :  { %124 = vmatpush.bf16.msra.mxu0 %v118_v5  ;;  %287 = vmatpush.bf16.msra.mxu3 %v406_v23  ;;  %v413_v25 = vld [vmem:[%s609_s4] ss:$0 sm:$0xff] }
  0x14   :  { %v403_v32 = vld [vmem:[%s612_s7] sm:$0xff] }
  0x15   :  { %v414_v33 = vld [vmem:[%s611_s6] ss:$0 sm:$0xff] }
  0x16   :  { %181 = vmatpush.bf16.msra.mxu1 %v396_v11  ;;  %234 = vmatpush.bf16.msra.mxu2 %v401_v14  ;;  %v415_v39 = vld [vmem:[%s613_s8] ss:$0 sm:$0xff] }
  0x17   :  { %125 = vmatpush.bf16.msra.mxu0 %v394_v6  ;;  %288 = vmatpush.bf16.msra.mxu3 %v405_v24 }
  0x1a   :  { %182 = vmatpush.bf16.msra.mxu1 %v395_v12  ;;  %235 = vmatpush.bf16.msra.mxu2 %v400_v21 }
  0x1b   :  { %126 = vmatpush.bf16.msra.mxu0 %v393_v7  ;;  %289 = vmatpush.bf16.msra.mxu3 %v404_v31 }
  0x1e   :  { %236 = vmatpush.bf16.msra.mxu2 %v399_v22 }
  0x1f   :  { %127 = vmatpush.bf16.msra.mxu0 %v392_v8  ;;  %290 = vmatpush.bf16.msra.mxu3 %v403_v32 }
  0x22   :  { %340 = vmatmul.msk.bf16.vlgmr.msra.gmra.mxu0 %vm112_vm1, %v79_v10 }
  0x9f   :  { %v129_v16 = vpop.f32.mrf.mxu0 }
  0xa0   :  { %v130_v17 = vadd.f32 %v412_v15, %v129_v16 }
  0xa2   :  { %v133_v18 = vmax.f32 %v130_v17, 0.0 }
  0xa4   :  { %v134_v19 = vpack.c.bf16 %v133_v18, %v133_v18 }
  0xa6   :  { %357 = vmatmul.msk.bf16.vlgmr.msra.gmra.mxu1 %vm171_vm2, %v134_v19 }
  0xa7   :  { %v131_v20 = vpop.f32.mrf.mxu0 }
 0x123   :  { %v184_v26 = vpop.f32.mrf.mxu1 }
 0x124   :  { %v185_v27 = vadd.f32 %v413_v25, %v184_v26 }
 0x126   :  { %v188_v28 = vmax.f32 %v185_v27, 0.0 }
 0x128   :  { %v189_v29 = vpack.c.bf16 %v188_v28, %v188_v28 }
 0x12a   :  { %374 = vmatmul.msk.bf16.vlgmr.msra.gmra.mxu2 %vm171_vm2, %v189_v29 }
 0x12b   :  { %v186_v30 = vpop.f32.mrf.mxu1 }
 0x1ad   :  { %v238_v34 = vpop.f32.mrf.mxu2 }
 0x1ae   :  { %v239_v35 = vadd.f32 %v414_v33, %v238_v34 }
 0x1b0   :  { %v242_v36 = vmax.f32 %v239_v35, 0.0 }
 0x1b2   :  { %v243_v37 = vpack.c.bf16 %v242_v36, %v242_v36 }
 0x1b4   :  { %391 = vmatmul.msk.bf16.vlgmr.msra.gmra.mxu3 %vm171_vm2, %v243_v37 }
 0x1b5   :  { %v240_v38 = vpop.f32.mrf.mxu2 }
 0x237   :  { %v292_v40 = vpop.f32.mrf.mxu3 }
 0x238   :  { %v293_v41 = vadd.f32 %v415_v39, %v292_v40 }
 0x23a   :  { %v297_v42 = vsel %vm296_vm3, %v293_v41, -inf }
 0x23b   :  { %298 = vmax.xlane.f32.xlu0 %v297_v42 }
 0x23f   :  { %v294_v43 = vpop.f32.mrf.mxu3 }
 0x2ae   :  { %v299_v44 = vpop.xlane.xlu0 %298 }
 0x2af   :  { %v300_v45 = vsub.f32 %v293_v41, %v299_v44 }
 0x2b1   :  { %v301_v46 = vmul.f32 1.442695, %v300_v45 }
 0x2b3   :  { %416 = vpow2.f32 %v301_v46 }
 0x2b9   :  { %v417_v47 = vpop.eup %416 }
 0x2ba   :  { %v303_v48 = vsel %vm296_vm3, %v417_v47, 0.0 }
 0x2bb   :  { %304 = vadd.xlane.f32.xlu0 %v303_v48 }
 0x32e   :  { %v305_v49 = vpop.xlane.xlu0 %304 }
 0x32f   :  { %418 = vrcp.f32 %v305_v49  ;;  %v317_v53 = vand.u32 2147483648, %v305_v49  ;;  %v315_v55 = vand.u32 2147483647, %v305_v49  ;;  %vm311_vm5 = vweird.f32 %v305_v49 }
 0x331   :  { %v318_v57 = vor.u32 1.1754944e-38, %v317_v53  ;;  %vm316_vm7 = vcmp.eq.f32.partialorder %v315_v55, 8.507059e+37 }
 0x335   :  { %v419_v50 = vpop.eup %418 }
 0x336   :  { %v307_v51 = vmul.f32 %v419_v50, %v305_v49  ;;  %vm312_vm4 = vweird.f32 %v419_v50 }
 0x337   :  { %vm313_vm6 = vmor %vm311_vm5, %vm312_vm4 }
 0x338   :  { %v308_v52 = vsub.f32 1.0, %v307_v51 }
 0x33a   :  { %v309_v54 = vmul.f32 %v419_v50, %v308_v52 }
 0x33c   :  { %v310_v56 = vadd.f32 %v419_v50, %v309_v54 }
 0x33e   :  { %v314_v58 = vsel %vm313_vm6, %v419_v50, %v310_v56 }
 0x33f   :  { %v319_v59 = vsel %vm316_vm7, %v318_v57, %v314_v58 }
 0x340   :  { %v320_v60 = vmul.f32 %v417_v47, %v319_v59 }
 0x342   :  { %321 = vst.msk [vmem:[%s614_s9] sm:$0xff] %vm296_vm3, %v320_v60 }
 0x343   :  { %326 = vsyncpa [#allocation3], 1 }
 0x344   :  { %327 = vsyncpa [#allocation5], 1 }

</bundles_post_ra>
